<compile_context>
chip_gen: v5e
topology: v5e:2x2
jax: 0.10.0
libtpu: 0.0.40
codegen_flags: <defaults>
</compile_context>

<pallas_src>
import functools

import jax
import jax.numpy as jnp
from jax.experimental import pallas as pl
from jax.experimental.pallas import tpu as pltpu


def _round_up(x: int, m: int) -> int:
    return ((x + m - 1) // m) * m


def pack_actor_critic_params(w_actor, b_actor, w_critic, b_critic, *, dtype=jnp.float32):
    """Pack actor+critic weights AND biases into one lane/sublane-padded slab.

    Layout (rows x lanes), Npad = max(128, round_up(A+1, 128)):
      rows [0, D)          : weight rows  (actor cols [0, A), critic col A, zeros elsewhere)
      row  R = round_up(D,8): bias row    (actor bias cols [0, A), critic bias col A)
      rows (R, R+8)        : zero padding (keeps the bias slice sublane-aligned)

    Call once per optimizer step (weights only change there), NOT per loss eval.
    """
    D, A = w_actor.shape
    n_pad = max(128, _round_up(A + 1, 128))
    r_bias = _round_up(D, 8)
    slab = jnp.zeros((r_bias + 8, n_pad), dtype)
    slab = slab.at[:D, :A].set(w_actor.astype(dtype))
    slab = slab.at[:D, A:A + 1].set(w_critic.astype(dtype).reshape(D, 1))
    slab = slab.at[r_bias, :A].set(b_actor.astype(dtype).reshape(A))
    slab = slab.at[r_bias, A:A + 1].set(b_critic.astype(dtype).reshape(1))
    return slab


def _a2c_partial_kernel(obs_ref, aux_ref, slab_ref, out_ref, *,
                        num_actions: int,
                        weight_rows: int,
                        bias_row: int,
                        total_rows: int,
                        mask_rows: bool,
                        need_norm_stats: bool,
                        compute_critic_loss: bool):
    f32 = jnp.float32
    obs = obs_ref[...]                                   # (Tt, D)
    aux = aux_ref[...]                                   # (Tt, 3): adv | value_target | action
    tt = obs.shape[0]
    n_pad = slab_ref.shape[1]
    a = num_actions

    adv = aux[:, 0:1]                                    # (Tt, 1) raw (un-normalized) advantage
    act = aux[:, 2:3].astype(jnp.int32)                  # exact for action ids < 2^24

    # fused actor+critic matmul; bias lives in the same slab (one DMA, one MXU push)
    w = slab_ref[0:weight_rows, :]                       # (D, Npad) static sublane slice
    b = slab_ref[bias_row:bias_row + 1, :]               # (1, Npad) static, sublane-aligned
    fused = jnp.dot(obs, w, preferred_element_type=f32) + b       # (Tt, Npad)

    col = jax.lax.broadcasted_iota(jnp.int32, (tt, n_pad), 1)
    valid = col < a                                      # actor logit columns
    neg_big = f32(-1e30)

    # log-softmax over the A actor columns (padding/critic columns masked out once)
    masked_logits = jnp.where(valid, fused, neg_big)
    m = jnp.max(masked_logits, axis=-1, keepdims=True)   # (Tt, 1)
    z = masked_logits - m                                # invalid lanes stay ~-1e30; exp -> 0
    ez = jnp.exp(z)
    sum_ez = jnp.sum(ez, axis=-1, keepdims=True)         # (Tt, 1)
    lse = jnp.log(sum_ez)
    log_probs = z - lse

    # log_prob at the taken action via one-hot (act < A, so it hits a valid lane)
    onehot = (col == act).astype(f32)
    act_logprob = jnp.sum(onehot * log_probs, axis=-1, keepdims=True)   # (Tt, 1)

    # entropy: H = lse - sum(ez*z)/sum_ez  (ez == 0 on masked lanes -> exact 0 contribution)
    ent_row = lse - jnp.sum(ez * z, axis=-1, keepdims=True) / sum_ez    # (Tt, 1)

    if compute_critic_loss:
        vt = aux[:, 1:2]                                  # (Tt, 1)
        pred = jnp.sum(jnp.where(col == a, fused, f32(0.0)),
                       axis=-1, keepdims=True)            # critic column A
        diff = vt - pred
    else:
        diff = None

    if mask_rows:
        # last tile is zero-padded past the real rollout length; mask its rows out
        row = (jax.lax.broadcasted_iota(jnp.int32, (tt, 1), 0)
               + pl.program_id(0) * tt)
        rmask = (row < total_rows).astype(f32)
        act_logprob = act_logprob * rmask
        ent_row = ent_row * rmask
        if compute_critic_loss:
            diff = diff * rmask
        # adv / adv^2 sums need no mask: padded advantage rows are exactly zero

    # per-tile partial sums (scalars)
    s_lpa = jnp.sum(act_logprob * adv)
    s_ent = jnp.sum(ent_row)
    s_crit = jnp.sum(diff * diff) if compute_critic_loss else f32(0.0)
    if need_norm_stats:
        s_lp = jnp.sum(act_logprob)
        s_adv = jnp.sum(adv)
        s_adv2 = jnp.sum(adv * adv)
    else:
        s_lp = f32(0.0)
        s_adv = f32(0.0)
        s_adv2 = f32(0.0)

    # lane-dense output row for this tile: lanes 0..5 carry the six partial sums
    lane = jax.lax.broadcasted_iota(jnp.int32, out_ref.shape, 2)
    out_ref[...] = jnp.where(lane == 0, s_lpa,
                   jnp.where(lane == 1, s_ent,
                   jnp.where(lane == 2, s_crit,
                   jnp.where(lane == 3, s_lp,
                   jnp.where(lane == 4, s_adv,
                   jnp.where(lane == 5, s_adv2, f32(0.0)))))))


def multi_reward_a2c_loss(obs, action, advantage, value_target, packed_slab,
                          num_actions, *,
                          normalize_adv: bool = True,
                          compute_critic_loss: bool = True,
                          t_tile: int = 256):
    """Pallas wrapper. Takes the pre-packed weight/bias slab (see pack_actor_critic_params)."""
    T, D = obs.shape
    assert advantage.shape == (T, 1), f"Expected shape (len, 1), got {advantage.shape}"
    f32 = jnp.float32

    if obs.dtype != packed_slab.dtype:
        obs = obs.astype(packed_slab.dtype)

    # pack advantage / value_target / action into one (T, 3) f32 array (single DMA)
    aux = jnp.concatenate(
        [advantage.astype(f32),
         value_target.astype(f32),
         action.reshape(T, 1).astype(f32)], axis=1)

    # --- tiling over T: pipelines the obs DMA, fills the MXU, megacore-friendly ---
    t_tile = max(8, _round_up(min(t_tile, _round_up(T, 8)), 8))
    t_pad = _round_up(T, t_tile)
    n_tiles = t_pad // t_tile
    if t_pad != T:
        obs = jnp.pad(obs, ((0, t_pad - T), (0, 0)))
        aux = jnp.pad(aux, ((0, t_pad - T), (0, 0)))

    do_norm = bool(normalize_adv) and T > 1
    slab_rows, n_pad = packed_slab.shape

    kernel = functools.partial(
        _a2c_partial_kernel,
        num_actions=num_actions,
        weight_rows=D,
        bias_row=slab_rows - 8,
        total_rows=T,
        mask_rows=(t_pad != T),
        need_norm_stats=do_norm,
        compute_critic_loss=compute_critic_loss,
    )

    partials = pl.pallas_call(
        kernel,
        out_shape=jax.ShapeDtypeStruct((n_tiles, 8, 128), f32),
        grid_spec=pltpu.PrefetchScalarGridSpec(
            num_scalar_prefetch=0,
            grid=(n_tiles,),
            in_specs=[
                pl.BlockSpec((t_tile, D), lambda i: (i, 0)),
                pl.BlockSpec((t_tile, 3), lambda i: (i, 0)),
                # constant block index -> weight slab stays resident across tiles
                pl.BlockSpec((slab_rows, n_pad), lambda i: (0, 0)),
            ],
            out_specs=pl.BlockSpec((1, 8, 128), lambda i: (i, 0, 0)),
        ),
        compiler_params=pltpu.CompilerParams(
            dimension_semantics=("parallel",)),
    )(obs, aux, packed_slab)

    # tiny final reduce + scalar epilogue (exact sqrt / division for parity)
    if n_tiles > 1:
        totals = jnp.sum(partials[:, 0, :], axis=0)
    else:
        totals = partials[0, 0]
    s_lpa, s_ent, s_crit = totals[0], totals[1], totals[2]
    inv_t = f32(1.0 / T)

    if do_norm:
        s_lp, s_adv, s_adv2 = totals[3], totals[4], totals[5]
        loc = s_adv * inv_t
        # torch .std() is unbiased (ddof=1) followed by clamp_min(1e-6)
        var = jnp.maximum(s_adv2 - f32(T) * loc * loc, f32(0.0)) / f32(T - 1)
        scale = jnp.maximum(jnp.sqrt(var), f32(1e-6))
        # -mean(lp * (adv - loc)/scale) == -(sum(lp*adv) - loc*sum(lp)) / (T*scale)
        loss_obj = -(s_lpa - loc * s_lp) / (f32(T) * scale)
    else:
        # note: torch would propagate NaN for normalize+T==1 (unbiased std of 1 elem);
        # here normalization is skipped for T==1, matching advantage.numel() > 1 guard.
        loss_obj = -s_lpa * inv_t

    td_out = {"loss_objective": loss_obj, "entropy": s_ent * inv_t}
    if compute_critic_loss:
        td_out["loss_critic"] = s_crit * inv_t
    return td_out


if __name__ == "__main__":
    # small shapes consistent with the module: seq T=8, obs hidden D=32, A=8 actions
    T, D, A = 8, 32, 8
    key = jax.random.PRNGKey(0)
    k_obs, k_act, k_adv, k_vt, k_wa, k_ba, k_wc, k_bc = jax.random.split(key, 8)

    obs = jax.random.normal(k_obs, (T, D), jnp.float32)
    action = jax.random.randint(k_act, (T,), 0, A, jnp.int32)
    scalarized_advantage = jax.random.normal(k_adv, (T, 1), jnp.float32)
    value_target = jax.random.normal(k_vt, (T, 1), jnp.float32)

    # deterministic synthetic actor / critic parameters
    w_actor = jax.random.normal(k_wa, (D, A), jnp.float32) * 0.1
    b_actor = jax.random.normal(k_ba, (A,), jnp.float32) * 0.1
    w_critic = jax.random.normal(k_wc, (D, 1), jnp.float32) * 0.1
    b_critic = jax.random.normal(k_bc, (1,), jnp.float32) * 0.1

    # HOISTED: pack weights+biases once per optimizer step, not per loss eval.
    slab = pack_actor_critic_params(w_actor, b_actor, w_critic, b_critic, dtype=jnp.float32)

    loss_fn = jax.jit(
        multi_reward_a2c_loss,
        static_argnames=("num_actions", "normalize_adv", "compute_critic_loss", "t_tile"))

    td_out = loss_fn(obs, action, scalarized_advantage, value_target, slab,
                     num_actions=A, normalize_adv=True, compute_critic_loss=True)
    jax.block_until_ready(td_out)

    # TODO(synk): PopArt-normalized value targets (policy.does_use_popart=True branch)
    # are not modeled; raw value_target / predicted_value are used as in the False branch.
    print("KERNEL_OK")
</pallas_src>

<mosaic_0001>
module attributes {stable_mosaic.version = 11 : i64} {
  func.func @_a2c_partial_kernel(%arg0: i32, %arg1: memref<8x32xf32, #tpu.memory_space<vmem>>, %arg2: memref<8x3xf32, #tpu.memory_space<vmem>>, %arg3: memref<40x128xf32, #tpu.memory_space<vmem>>, %arg4: memref<1x8x128xf32, #tpu.memory_space<vmem>>) attributes {dimension_semantics = [#tpu.dimension_semantics<parallel>], iteration_bounds = array<i64: 1>, scalar_prefetch = 0 : i64, scratch_operands = 0 : i64, tpu.core_type = #tpu.core_type<tc>, window_params = [{transform_indices = @transform_0, window_bounds = array<i64: 8, 32>}, {transform_indices = @transform_1, window_bounds = array<i64: 8, 3>}, {pipeline_mode = #tpu.pipeline_mode<synchronous>, transform_indices = @transform_2, window_bounds = array<i64: 40, 128>}, {transform_indices = @transform_3, window_bounds = array<i64: 1, 8, 128>}]} {
    %c0 = arith.constant 0 : index
    %c0_0 = arith.constant 0 : index
    %0 = vector.load %arg1[%c0, %c0_0] : memref<8x32xf32, #tpu.memory_space<vmem>>, vector<8x32xf32>
    %c0_1 = arith.constant 0 : index
    %c0_2 = arith.constant 0 : index
    %1 = vector.load %arg2[%c0_1, %c0_2] : memref<8x3xf32, #tpu.memory_space<vmem>>, vector<8x3xf32>
    %2 = vector.extract_strided_slice %1 {offsets = [0, 0], sizes = [8, 1], strides = [1, 1]} : vector<8x3xf32> to vector<8x1xf32>
    %3 = vector.extract_strided_slice %1 {offsets = [0, 2], sizes = [8, 1], strides = [1, 1]} : vector<8x3xf32> to vector<8x1xf32>
    %4 = arith.fptosi %3 : vector<8x1xf32> to vector<8x1xi32>
    %c0_3 = arith.constant 0 : index
    %c0_4 = arith.constant 0 : index
    %5 = vector.load %arg3[%c0_3, %c0_4] : memref<40x128xf32, #tpu.memory_space<vmem>>, vector<32x128xf32>
    %c32 = arith.constant 32 : index
    %c0_5 = arith.constant 0 : index
    %6 = vector.load %arg3[%c32, %c0_5] : memref<40x128xf32, #tpu.memory_space<vmem>>, vector<1x128xf32>
    %cst = arith.constant dense<0.000000e+00> : vector<8x128xf32>
    %7 = tpu.matmul %0, %5, %cst {dimension_numbers = #tpu.dot_dimension_numbers<[1], [0], [0], [1], [0, 0, 1, 1], [], []>} : vector<8x32xf32>, vector<32x128xf32>, vector<8x128xf32> -> vector<8x128xf32>
    %8 = vector.broadcast %6 : vector<1x128xf32> to vector<8x128xf32>
    %9 = arith.addf %7, %8 : vector<8x128xf32>
    %10 = tpu.iota {dimensions = array<i32: 1>} : vector<8x128xi32>
    %c8_i32 = arith.constant 8 : i32
    %11 = vector.broadcast %c8_i32 : i32 to vector<8x128xi32>
    %12 = arith.cmpi slt, %10, %11 : vector<8x128xi32>
    %cst_6 = arith.constant -1.000000e+30 : f32
    %13 = vector.broadcast %cst_6 : f32 to vector<8x128xf32>
    %14 = arith.select %12, %9, %13 : vector<8x128xi1>, vector<8x128xf32>
    %cst_7 = arith.constant dense<0xFF800000> : vector<8xf32>
    %15 = vector.multi_reduction <maximumf>, %14, %cst_7 [1] : vector<8x128xf32> to vector<8xf32>
    %16 = vector.shape_cast %15 : vector<8xf32> to vector<8x1xf32>
    %17 = vector.broadcast %16 : vector<8x1xf32> to vector<8x128xf32>
    %18 = arith.subf %14, %17 : vector<8x128xf32>
    %19 = math.exp %18 : vector<8x128xf32>
    %cst_8 = arith.constant dense<0.000000e+00> : vector<8xf32>
    %20 = vector.multi_reduction <add>, %19, %cst_8 [1] : vector<8x128xf32> to vector<8xf32>
    %21 = vector.shape_cast %20 : vector<8xf32> to vector<8x1xf32>
    %22 = math.log %21 : vector<8x1xf32>
    %23 = vector.broadcast %22 : vector<8x1xf32> to vector<8x128xf32>
    %24 = arith.subf %18, %23 : vector<8x128xf32>
    %25 = vector.broadcast %4 : vector<8x1xi32> to vector<8x128xi32>
    %26 = arith.cmpi eq, %10, %25 : vector<8x128xi32>
    %27 = arith.extui %26 : vector<8x128xi1> to vector<8x128xi32>
    %28 = arith.sitofp %27 : vector<8x128xi32> to vector<8x128xf32>
    %29 = arith.mulf %28, %24 : vector<8x128xf32>
    %cst_9 = arith.constant dense<0.000000e+00> : vector<8xf32>
    %30 = vector.multi_reduction <add>, %29, %cst_9 [1] : vector<8x128xf32> to vector<8xf32>
    %31 = vector.shape_cast %30 : vector<8xf32> to vector<8x1xf32>
    %32 = arith.mulf %19, %18 : vector<8x128xf32>
    %cst_10 = arith.constant dense<0.000000e+00> : vector<8xf32>
    %33 = vector.multi_reduction <add>, %32, %cst_10 [1] : vector<8x128xf32> to vector<8xf32>
    %34 = vector.shape_cast %33 : vector<8xf32> to vector<8x1xf32>
    %35 = arith.divf %34, %21 : vector<8x1xf32>
    %36 = arith.subf %22, %35 : vector<8x1xf32>
    %37 = vector.extract_strided_slice %1 {offsets = [0, 1], sizes = [8, 1], strides = [1, 1]} : vector<8x3xf32> to vector<8x1xf32>
    %c8_i32_11 = arith.constant 8 : i32
    %38 = vector.broadcast %c8_i32_11 : i32 to vector<8x128xi32>
    %39 = arith.cmpi eq, %10, %38 : vector<8x128xi32>
    %cst_12 = arith.constant 0.000000e+00 : f32
    %40 = vector.broadcast %cst_12 : f32 to vector<8x128xf32>
    %41 = arith.select %39, %9, %40 : vector<8x128xi1>, vector<8x128xf32>
    %cst_13 = arith.constant dense<0.000000e+00> : vector<8xf32>
    %42 = vector.multi_reduction <add>, %41, %cst_13 [1] : vector<8x128xf32> to vector<8xf32>
    %43 = vector.shape_cast %42 : vector<8xf32> to vector<8x1xf32>
    %44 = arith.subf %37, %43 : vector<8x1xf32>
    %45 = arith.mulf %31, %2 : vector<8x1xf32>
    %46 = vector.shape_cast %45 : vector<8x1xf32> to vector<1x8x1xf32>
    %cst_14 = arith.constant dense<0.000000e+00> : vector<1xf32>
    %47 = vector.multi_reduction <add>, %46, %cst_14 [1, 2] : vector<1x8x1xf32> to vector<1xf32>
    %48 = vector.shape_cast %47 : vector<1xf32> to vector<1x1x1xf32>
    %49 = vector.extract %48[0, 0, 0] : f32 from vector<1x1x1xf32>
    %50 = vector.shape_cast %36 : vector<8x1xf32> to vector<1x8x1xf32>
    %cst_15 = arith.constant dense<0.000000e+00> : vector<1xf32>
    %51 = vector.multi_reduction <add>, %50, %cst_15 [1, 2] : vector<1x8x1xf32> to vector<1xf32>
    %52 = vector.shape_cast %51 : vector<1xf32> to vector<1x1x1xf32>
    %53 = vector.extract %52[0, 0, 0] : f32 from vector<1x1x1xf32>
    %54 = arith.mulf %44, %44 : vector<8x1xf32>
    %55 = vector.shape_cast %54 : vector<8x1xf32> to vector<1x8x1xf32>
    %cst_16 = arith.constant dense<0.000000e+00> : vector<1xf32>
    %56 = vector.multi_reduction <add>, %55, %cst_16 [1, 2] : vector<1x8x1xf32> to vector<1xf32>
    %57 = vector.shape_cast %56 : vector<1xf32> to vector<1x1x1xf32>
    %58 = vector.extract %57[0, 0, 0] : f32 from vector<1x1x1xf32>
    %59 = vector.shape_cast %31 : vector<8x1xf32> to vector<1x8x1xf32>
    %cst_17 = arith.constant dense<0.000000e+00> : vector<1xf32>
    %60 = vector.multi_reduction <add>, %59, %cst_17 [1, 2] : vector<1x8x1xf32> to vector<1xf32>
    %61 = vector.shape_cast %60 : vector<1xf32> to vector<1x1x1xf32>
    %62 = vector.extract %61[0, 0, 0] : f32 from vector<1x1x1xf32>
    %63 = vector.shape_cast %2 : vector<8x1xf32> to vector<1x8x1xf32>
    %cst_18 = arith.constant dense<0.000000e+00> : vector<1xf32>
    %64 = vector.multi_reduction <add>, %63, %cst_18 [1, 2] : vector<1x8x1xf32> to vector<1xf32>
    %65 = vector.shape_cast %64 : vector<1xf32> to vector<1x1x1xf32>
    %66 = vector.extract %65[0, 0, 0] : f32 from vector<1x1x1xf32>
    %67 = arith.mulf %2, %2 : vector<8x1xf32>
    %68 = vector.shape_cast %67 : vector<8x1xf32> to vector<1x8x1xf32>
    %cst_19 = arith.constant dense<0.000000e+00> : vector<1xf32>
    %69 = vector.multi_reduction <add>, %68, %cst_19 [1, 2] : vector<1x8x1xf32> to vector<1xf32>
    %70 = vector.shape_cast %69 : vector<1xf32> to vector<1x1x1xf32>
    %71 = vector.extract %70[0, 0, 0] : f32 from vector<1x1x1xf32>
    %72 = tpu.iota {dimensions = array<i32: 2>} : vector<1x8x128xi32>
    %c0_i32 = arith.constant 0 : i32
    %73 = vector.broadcast %c0_i32 : i32 to vector<1x8x128xi32>
    %74 = arith.cmpi eq, %72, %73 : vector<1x8x128xi32>
    %c1_i32 = arith.constant 1 : i32
    %75 = vector.broadcast %c1_i32 : i32 to vector<1x8x128xi32>
    %76 = arith.cmpi eq, %72, %75 : vector<1x8x128xi32>
    %c2_i32 = arith.constant 2 : i32
    %77 = vector.broadcast %c2_i32 : i32 to vector<1x8x128xi32>
    %78 = arith.cmpi eq, %72, %77 : vector<1x8x128xi32>
    %c3_i32 = arith.constant 3 : i32
    %79 = vector.broadcast %c3_i32 : i32 to vector<1x8x128xi32>
    %80 = arith.cmpi eq, %72, %79 : vector<1x8x128xi32>
    %c4_i32 = arith.constant 4 : i32
    %81 = vector.broadcast %c4_i32 : i32 to vector<1x8x128xi32>
    %82 = arith.cmpi eq, %72, %81 : vector<1x8x128xi32>
    %c5_i32 = arith.constant 5 : i32
    %83 = vector.broadcast %c5_i32 : i32 to vector<1x8x128xi32>
    %84 = arith.cmpi eq, %72, %83 : vector<1x8x128xi32>
    %cst_20 = arith.constant 0.000000e+00 : f32
    %85 = vector.broadcast %71 : f32 to vector<1x8x128xf32>
    %86 = vector.broadcast %cst_20 : f32 to vector<1x8x128xf32>
    %87 = arith.select %84, %85, %86 : vector<1x8x128xi1>, vector<1x8x128xf32>
    %88 = vector.broadcast %66 : f32 to vector<1x8x128xf32>
    %89 = arith.select %82, %88, %87 : vector<1x8x128xi1>, vector<1x8x128xf32>
    %90 = vector.broadcast %62 : f32 to vector<1x8x128xf32>
    %91 = arith.select %80, %90, %89 : vector<1x8x128xi1>, vector<1x8x128xf32>
    %92 = vector.broadcast %58 : f32 to vector<1x8x128xf32>
    %93 = arith.select %78, %92, %91 : vector<1x8x128xi1>, vector<1x8x128xf32>
    %94 = vector.broadcast %53 : f32 to vector<1x8x128xf32>
    %95 = arith.select %76, %94, %93 : vector<1x8x128xi1>, vector<1x8x128xf32>
    %96 = vector.broadcast %49 : f32 to vector<1x8x128xf32>
    %97 = arith.select %74, %96, %95 : vector<1x8x128xi1>, vector<1x8x128xf32>
    %c0_21 = arith.constant 0 : index
    %c0_22 = arith.constant 0 : index
    %c0_23 = arith.constant 0 : index
    %98 = vector.load %arg4[%c0_21, %c0_22, %c0_23] : memref<1x8x128xf32, #tpu.memory_space<vmem>>, vector<1x8x128xf32>
    tpu.vector_store %arg4[%c0_21, %c0_22, %c0_23], %97 {strides = array<i32>} : memref<1x8x128xf32, #tpu.memory_space<vmem>>, vector<1x8x128xf32>,
    return
  }
  func.func @transform_0(%arg0: i32) -> (i32, i32) {
    %c0_i32 = arith.constant 0 : i32
    %c0_i32_0 = arith.constant 0 : i32
    return %arg0, %c0_i32 : i32, i32
  }
  func.func @transform_1(%arg0: i32) -> (i32, i32) {
    %c0_i32 = arith.constant 0 : i32
    %c0_i32_0 = arith.constant 0 : i32
    return %arg0, %c0_i32 : i32, i32
  }
  func.func @transform_2(%arg0: i32) -> (i32, i32) {
    %c0_i32 = arith.constant 0 : i32
    %c0_i32_0 = arith.constant 0 : i32
    %c0_i32_1 = arith.constant 0 : i32
    return %c0_i32, %c0_i32_0 : i32, i32
  }
  func.func @transform_3(%arg0: i32) -> (i32, i32, i32) {
    %c0_i32 = arith.constant 0 : i32
    %c0_i32_0 = arith.constant 0 : i32
    %c0_i32_1 = arith.constant 0 : i32
    return %arg0, %c0_i32, %c0_i32_0 : i32, i32, i32
  }
}

</mosaic_0001>

<bundles_post_ra>
// kernel: multi_reward_a2c_loss.1
= control target key start
LH: loop header
LB: loop body
LE: loop exit
PB: predicated region body
PF: predicated region fallthrough
CT: control target
= control target key end

     0   :  { %v216_v2 = vmov 2   ;;  %vm23_vm1 = vcmask 261120   ;;  %v47_v11 = vlaneseq  ;;  %v218_v34 = vmov 0.0   ;;  %s290_s2 = inlined_call_operand.vmem [shape: f32[40,128], index: 2, kind: input, shape index: {}]   ;;  %s291_s1 = inlined_call_operand.vmem [shape: f32[8,3], index: 1, kind: input, shape index: {}]   ;;  %s292_s0 = inlined_call_operand.vmem [shape: f32[8,32], index: 0, kind: input, shape index: {}]   ;;  %s293_s3 = inlined_call_operand.vmem [shape: f32[1,8,128], index: 3, kind: output, shape index: {}]  }
   0x1   :  { %v20_v0 = vld [vmem:[%s290_s2 + $0x18] sm:$0xff]  ;;  %v19_v1 = vld [vmem:[%s290_s2 + $0x10] sm:$0xff]  ;;  %207 = vset.pattern.permute.xlu1 %v216_v2  ;;  %208 = vset.pattern.permute.xlu0 %v216_v2  ;;  %v248_v3 = vld [vmem:[%s291_s1] sm:$0xff]  ;;  %vm95_vm8 = vcmask 7168  }
   0x2   :  { %39 = vmatpush.msra.mxu0 %v20_v0  ;;  %v18_v4 = vld [vmem:[%s290_s2 + $0x8] sm:$0xff]  ;;  %vm187_vm0 = vcmp.lt.s32.totalorder %v248_v3, 0  ;;  %v188_v5 = vceil.f32 %v248_v3  ;;  %v189_v6 = vfloor.f32 %v248_v3  ;;  %v17_v7 = vld [vmem:[%s290_s2] sm:$0xff]  ;;  %v262_v12 = vand.u32 127, %v47_v11 }
   0x3   :  { %v14_v9 = vld [vmem:[%s292_s0] sm:$0xff]  ;;  %s217_s0 = smov 127   ;;  %v141_v50 = vsel %vm95_vm8, %v248_v3, 0.0  ;;  %v151_v55 = vmul.f32 %v248_v3, %v248_v3 }
   0x4   :  { %40 = vmatpush.msra.mxu0 %v19_v1  ;;  %v190_v8 = vsel %vm187_vm0, %v188_v5, %v189_v6  ;;  %v209_v13 = vld [vmem:[%s290_s2 + $0x20] ss:$0 sm:$0xff]  ;;  %vm89_vm2 = vcmp.eq.s32.totalorder %v262_v12, 8  ;;  %vm49_vm3 = vcmp.lt.s32.totalorder %v262_v12, 8  ;;  %vm167_vm10 = vcmp.eq.s32.totalorder %v262_v12, 5 }
   0x5   :  { %v191_v10 = vcvt.f32.s32 %v190_v8  ;;  %v152_v56 = vsel %vm95_vm8, %v151_v55, 0.0  ;;  %vm166_vm11 = vcmp.eq.s32.totalorder %v262_v12, 4  ;;  %vm165_vm12 = vcmp.eq.s32.totalorder %v262_v12, 3 }
   0x6   :  { %41 = vmatpush.msra.mxu0 %v18_v4  ;;  %vm164_vm13 = vcmp.eq.s32.totalorder %v262_v12, 2  ;;  %vm163_vm14 = vcmp.eq.s32.totalorder %v262_v12, 1  ;;  %vm162_vm15 = vcmp.eq.s32.totalorder %v262_v12, 0 }
   0x7   :  { %62 = vperm.xlu1 %207, %v191_v10  }
   0x8   :  { %42 = vmatpush.msra.mxu0 %v17_v7 }
   0x9   :  { %185 = vmatmul.msk.f32.vlgmr.msra.gmra.mxu0 %vm23_vm1, %v14_v9 }
  0x79   :  { %v63_v23 = vpop.permute.xlu1 %62 }
  0x7a   :  { %vm64_vm4 = vcmp.eq.s32.totalorder %v262_v12, %v63_v23 }
  0x7b   :  { %v186_v35 = vsel %vm64_vm4, 1.0, %v218_v34 }
  0x86   :  { %v44_v14 = vpop.f32.mrf.mxu0 }
  0x87   :  { %v45_v15 = vadd.f32 %v209_v13, %v44_v14 }
  0x89   :  { %v90_v16 = vsel %vm89_vm2, %v45_v15, 0.0  ;;  %v50_v17 = vsel %vm49_vm3, %v45_v15, -1e+30 }
  0x8a   :  { %91 = vadd.xlane.f32.xlu1 %v90_v16  ;;  %51 = vmax.xlane.f32.xlu0 %v50_v17 }
  0xfd   :  { %v52_v18 = vpop.xlane.xlu0 %51  ;;  %v92_v24 = vpop.xlane.xlu1 %91 }
  0xfe   :  { %v53_v19 = vsub.f32 %v50_v17, %v52_v18  ;;  %v93_v25 = vsub.f32 %v248_v3, %v92_v24 }
 0x100   :  { %v54_v20 = vmul.f32 1.442695, %v53_v19  ;;  %v116_v26 = vmul.f32 %v93_v25, %v93_v25 }
 0x102   :  { %210 = vpow2.f32 %v54_v20 }
 0x108   :  { %v211_v21 = vpop.eup %210 }
 0x109   :  { %56 = vadd.xlane.f32.xlu0 %v211_v21  ;;  %v70_v22 = vmul.f32 %v211_v21, %v53_v19 }
 0x10b   :  { %71 = vadd.xlane.f32.xlu2 %v70_v22 }
 0x11d   :  { %118 = vrot.lane.b32.xlu0 %v116_v26, %s217_s0 }
 0x17c   :  { %v57_v27 = vpop.xlane.xlu0 %56 }
 0x17d   :  { %212 = vrcp.f32 %v57_v27  ;;  %v84_v37 = vand.u32 2147483648, %v57_v27  ;;  %vm78_vm6 = vweird.f32 %v57_v27  ;;  %v82_v40 = vand.u32 2147483647, %v57_v27 }
 0x17e   :  { %214 = vlog2.f32 %v57_v27  ;;  %v72_v46 = vpop.xlane.xlu2 %71 }
 0x17f   :  { %v85_v42 = vor.u32 1.1754944e-38, %v84_v37  ;;  %vm83_vm9 = vcmp.eq.f32.partialorder %v82_v40, 8.507059e+37 }
 0x183   :  { %v213_v28 = vpop.eup %212 }
 0x184   :  { %v215_v29 = vpop.eup %214  ;;  %v74_v30 = vmul.f32 %v213_v28, %v57_v27  ;;  %vm79_vm5 = vweird.f32 %v213_v28 }
 0x185   :  { %v59_v31 = vmul.f32 0.6931472, %v215_v29  ;;  %vm80_vm7 = vmor %vm78_vm6, %vm79_vm5 }
 0x186   :  { %v75_v32 = vsub.f32 1.0, %v74_v30 }
 0x187   :  { %v60_v33 = vsub.f32 %v53_v19, %v59_v31 }
 0x188   :  { %v76_v36 = vmul.f32 %v213_v28, %v75_v32 }
 0x189   :  { %v67_v38 = vmul.f32 %v186_v35, %v60_v33 }
 0x18a   :  { %v77_v39 = vadd.f32 %v213_v28, %v76_v36 }
 0x18b   :  { %68 = vadd.xlane.f32.xlu2 %v67_v38 }
 0x18c   :  { %v81_v41 = vsel %vm80_vm7, %v213_v28, %v77_v39 }
 0x18d   :  { %v86_v43 = vsel %vm83_vm9, %v85_v42, %v81_v41 }
 0x18e   :  { %v87_v47 = vmul.f32 %v86_v43, %v72_v46 }
 0x18f   :  { %v119_v44 = vpop.permute.xlu0 %118 }
 0x190   :  { %v121_v45 = vsel %vm95_vm8, %v119_v44, 0.0  ;;  %v88_v48 = vsub.f32 %v59_v31, %v87_v47 }
 0x192   :  { %v106_v49 = vsel %vm95_vm8, %v88_v48, 0.0 }
 0x193   :  { %122 = vadd.xlane.f32.xlu2 %v121_v45 }
 0x19b   :  { %107 = vadd.xlane.f32.xlu2 %v106_v49 }
 0x1a3   :  { %142 = vadd.xlane.f32.xlu2 %v141_v50 }
 0x1fe   :  { %v69_v51 = vpop.xlane.xlu2 %68 }
 0x1ff   :  { %v94_v52 = vmul.f32 %v69_v51, %v248_v3  ;;  %v131_v53 = vsel %vm95_vm8, %v69_v51, 0.0 }
 0x200   :  { %132 = vadd.xlane.f32.xlu0 %v131_v53 }
 0x201   :  { %v96_v54 = vsel %vm95_vm8, %v94_v52, 0.0 }
 0x202   :  { %97 = vadd.xlane.f32.xlu2 %v96_v54 }
 0x206   :  { %v123_v57 = vpop.xlane.xlu2 %122 }
 0x207   :  { %v124_v61 = vrot.slane %v123_v57, 4 }
 0x209   :  { %v125_v0 = vadd.f32 %v124_v61, %v123_v57 }
 0x20a   :  { %153 = vadd.xlane.f32.xlu2 %v152_v56 }
 0x20b   :  { %v126_v7 = vrot.slane %v125_v0, 2 }
 0x20d   :  { %v127_v15 = vadd.f32 %v126_v7, %v125_v0 }
 0x20e   :  { %v108_v58 = vpop.xlane.xlu2 %107 }
 0x20f   :  { %v109_v59 = vrot.slane %v108_v58, 4  ;;  %v128_v23 = vrot.slane %v127_v15, 1 }
 0x211   :  { %v110_v63 = vadd.f32 %v109_v59, %v108_v58  ;;  %v129_v30 = vadd.f32 %v128_v23, %v127_v15 }
 0x213   :  { %v111_v5 = vrot.slane %v110_v63, 2 }
 0x215   :  { %v112_v13 = vadd.f32 %v111_v5, %v110_v63 }
 0x216   :  { %v143_v60 = vpop.xlane.xlu2 %142 }
 0x217   :  { %v144_v62 = vrot.slane %v143_v60, 4  ;;  %v113_v20 = vrot.slane %v112_v13, 1 }
 0x219   :  { %v145_v2 = vadd.f32 %v144_v62, %v143_v60  ;;  %v114_v28 = vadd.f32 %v113_v20, %v112_v13 }
 0x21b   :  { %v146_v3 = vrot.slane %v145_v2, 2 }
 0x21d   :  { %v147_v18 = vadd.f32 %v146_v3, %v145_v2 }
 0x21f   :  { %v148_v27 = vrot.slane %v147_v18, 1 }
 0x221   :  { %v149_v33 = vadd.f32 %v148_v27, %v147_v18 }
 0x273   :  { %v133_v1 = vpop.xlane.xlu0 %132 }
 0x274   :  { %v134_v4 = vrot.slane %v133_v1, 4 }
 0x275   :  { %v98_v6 = vpop.xlane.xlu2 %97 }
 0x276   :  { %v135_v8 = vadd.f32 %v134_v4, %v133_v1  ;;  %v99_v9 = vrot.slane %v98_v6, 4 }
 0x278   :  { %v136_v10 = vrot.slane %v135_v8, 2  ;;  %v100_v11 = vadd.f32 %v99_v9, %v98_v6 }
 0x27a   :  { %v101_v14 = vrot.slane %v100_v11, 2  ;;  %v137_v16 = vadd.f32 %v136_v10, %v135_v8 }
 0x27c   :  { %v102_v17 = vadd.f32 %v101_v14, %v100_v11  ;;  %v138_v24 = vrot.slane %v137_v16, 1 }
 0x27d   :  { %v154_v19 = vpop.xlane.xlu2 %153 }
 0x27e   :  { %v155_v21 = vrot.slane %v154_v19, 4  ;;  %v103_v22 = vrot.slane %v102_v17, 1  ;;  %v139_v31 = vadd.f32 %v138_v24, %v137_v16 }
 0x280   :  { %v156_v25 = vadd.f32 %v155_v21, %v154_v19  ;;  %v104_v26 = vadd.f32 %v103_v22, %v102_v17 }
 0x282   :  { %v157_v29 = vrot.slane %v156_v25, 2  ;;  %192 = vpush %v104_v26 }
 0x283   :  { %194 = vpush %v114_v28 }
 0x284   :  { %v158_v32 = vadd.f32 %v157_v29, %v156_v25  ;;  %196 = vpush %v129_v30 }
 0x285   :  { %198 = vpush %v139_v31 }
 0x286   :  { %200 = vpush %v149_v33  ;;  %v159_v34 = vrot.slane %v158_v32, 1 }
 0x288   :  { %v160_v35 = vadd.f32 %v159_v34, %v158_v32 }
 0x28a   :  { %202 = vpush %v160_v35 }
 0x2b3   :  { %s193_s2 = spop %192 }
 0x2b4   :  { %s195_s25 = spop %194  ;;  %v178_v45 = vstv %s193_s2 }
 0x2b5   :  { %s197_s26 = spop %196  ;;  %v176_v43 = vstv %s195_s25 }
 0x2b6   :  { %s199_s27 = spop %198  ;;  %v174_v41 = vstv %s197_s26 }
 0x2b7   :  { %s201_s28 = spop %200  ;;  %v172_v39 = vstv %s199_s27 }
 0x2b8   :  { %v170_v37 = vstv %s201_s28 }
 0x2bb   :  { %s203_s29 = spop %202 }
 0x2bc   :  { %v168_v36 = vstv %s203_s29 }
 0x2bd   :  { %v169_v38 = vsel %vm167_vm10, %v168_v36, 0.0 }
 0x2be   :  { %v171_v40 = vsel %vm166_vm11, %v170_v37, %v169_v38 }
 0x2bf   :  { %v173_v42 = vsel %vm165_vm12, %v172_v39, %v171_v40 }
 0x2c0   :  { %v175_v44 = vsel %vm164_vm13, %v174_v41, %v173_v42 }
 0x2c1   :  { %v177_v46 = vsel %vm163_vm14, %v176_v43, %v175_v44 }
 0x2c2   :  { %v179_v47 = vsel %vm162_vm15, %v178_v45, %v177_v46 }
 0x2c3   :  { %180 = vst [vmem:[%s293_s3] sm:$0xff] %v179_v47 }

</bundles_post_ra>
